<compile_context>
chip_gen: v7x
topology: tpu7x:2x2x1
jax: 0.10.0
libtpu: 0.0.40
codegen_flags: <defaults>
</compile_context>

<pallas_src>
import functools

import jax
import jax.numpy as jnp
import numpy as np
from jax.experimental import pallas as pl
from jax.experimental.pallas import tpu as pltpu

_MIB = 1024 * 1024


def _vmem_capacity_bytes():
    """Physical VMEM per TensorCore; conservative fallback if unqueryable."""
    try:
        return int(pltpu.get_tpu_info().vmem_capacity_bytes)
    except Exception:
        return 64 * _MIB  # v7x per-core VMEM; v5e/v6e have 128 MiB.


def _pose_kernel(x_ref, w_ref, b_ref, o_ref, *, tb, N):
    # x_ref: (tb, K, F)   w_ref: (K, N)   b_ref: (1, N) f32   o_ref: (F, tb*N)
    w = w_ref[...]
    bias = b_ref[...]
    for b in range(tb):  # static unroll; tb is a small compile-time constant
        xbt = x_ref[b].T  # (K, F) load -> (F, K) in-VMEM transpose
        y = jnp.dot(xbt, w, preferred_element_type=jnp.float32) + bias
        o_ref[:, b * N:(b + 1) * N] = y.astype(o_ref.dtype)


def _rot_vel_kernel(x_ref, wp_ref, bp_ref, wv_ref, bv_ref, o_ref, *, tb, N):
    # Frame 0 -> poseEmbedding, frames 1.. -> velEmbedding, fused in one kernel.
    wp = wp_ref[...]
    bp = bp_ref[...]
    wv = wv_ref[...]
    bv = bv_ref[...]
    for b in range(tb):
        xbt = x_ref[b].T  # (F, K)
        # Velocity embedding for every frame (frame 0 is overwritten below).
        yv = jnp.dot(xbt, wv, preferred_element_type=jnp.float32) + bv
        o_ref[:, b * N:(b + 1) * N] = yv.astype(o_ref.dtype)
        # Pose embedding for frame 0 only; overwrite row 0 of this batch column.
        y0 = jnp.dot(xbt[0:1, :], wp, preferred_element_type=jnp.float32) + bp
        o_ref[0:1, b * N:(b + 1) * N] = y0.astype(o_ref.dtype)


def _pick_batch_tile(bs, K, F, N, in_item, out_item, n_weights, budget):
    """Largest batch tile that divides bs, keeps the output block lane-legal
    (tb == bs or tb*N % 128 == 0) and fits the VMEM budget; prefer >= 2 grid
    steps when possible (v7x megacore sharding + pipelining)."""
    cands = [d for d in range(1, bs + 1)
             if bs % d == 0 and (d == bs or (d * N) % 128 == 0)]

    def footprint(tb):
        x_blk = 2 * tb * K * F * in_item             # double-buffered input tile
        o_blk = 2 * F * tb * N * out_item            # double-buffered output tile
        wgt = n_weights * (K * N * in_item + N * 4)  # resident weights + biases
        tmp = F * K * 4 + 2 * F * N * 4              # in-kernel transpose + f32 acc
        return x_blk + o_blk + wgt + tmp

    fits = [d for d in cands if footprint(d) <= budget]
    if not fits:
        tb = min(cands)
    else:
        tb = max(fits)
        if tb == bs:
            smaller = [d for d in fits if d < bs]
            if smaller:
                tb = max(smaller)
    return tb, footprint(tb)


def input_process(x, data_rep, pose_w, pose_b, vel_w=None, vel_b=None,
                  compute_dtype=None, out_dtype=None):
    """Pallas implementation of InputProcess.forward.

    x:       (bs, njoints, nfeats, nframes)
    pose_w:  (input_feats, latent_dim)  -- transposed vs torch Linear.weight
    pose_b:  (latent_dim,)
    vel_w / vel_b: same shapes, used only for data_rep == 'rot_vel'
    compute_dtype: optional (e.g. jnp.bfloat16) dtype for x / W on the MXU;
                   accumulation and the bias add stay in f32.
    out_dtype: optional output dtype (e.g. jnp.bfloat16); defaults to x.dtype.
    returns: (nframes, bs, latent_dim)
    """
    bs, njoints, nfeats, nframes = x.shape
    K = njoints * nfeats
    F = nframes
    N = pose_w.shape[1]
    if out_dtype is None:
        out_dtype = x.dtype

    rot_vel = data_rep == "rot_vel"
    if not rot_vel and data_rep not in ("rot6d", "xyz", "hml_vec"):
        raise ValueError(data_rep)
    if rot_vel and (vel_w is None or vel_b is None):
        raise ValueError("data_rep='rot_vel' requires velEmbedding parameters")

    # Free, contiguous view: (bs, njoints, nfeats, F) -> (bs, K, F).
    xv = x.reshape(bs, K, F)

    if compute_dtype is not None:
        # TODO(synk): in the real model fuse this cast into the producer (and
        # keep W in f32 if tighter accuracy is needed) so the bf16 copy of x
        # never costs an extra HBM round trip.
        xv = xv.astype(compute_dtype)
        pose_w = pose_w.astype(compute_dtype)
        if vel_w is not None:
            vel_w = vel_w.astype(compute_dtype)

    in_item = jnp.dtype(xv.dtype).itemsize
    out_item = jnp.dtype(out_dtype).itemsize
    n_weights = 2 if rot_vel else 1

    cap = _vmem_capacity_bytes()
    budget = int(0.55 * cap)
    tb, fp = _pick_batch_tile(bs, K, F, N, in_item, out_item, n_weights, budget)
    vmem_limit = int(min(0.9 * cap, max(32 * _MIB, 1.25 * fp + 4 * _MIB)))

    grid = (bs // tb,)
    x_spec = pl.BlockSpec((tb, K, F), lambda i: (i, 0, 0))
    # Whole-array VMEM residency for parameters: one copy, no double buffering.
    resident = pl.BlockSpec(memory_space=pltpu.MemorySpace.VMEM)
    out_spec = pl.BlockSpec((F, tb * N), lambda i: (0, i))

    pose_b2 = pose_b.reshape(1, N).astype(jnp.float32)

    flops = 2 * bs * F * K * N + (2 * bs * K * N if rot_vel else 0)
    bytes_accessed = (xv.size * in_item
                      + n_weights * (K * N * in_item + N * 4)
                      + F * bs * N * out_item)
    compiler_params = pltpu.CompilerParams(
        dimension_semantics=("parallel",),
        vmem_limit_bytes=vmem_limit)
    cost = pl.CostEstimate(flops=int(flops), transcendentals=0,
                           bytes_accessed=int(bytes_accessed))
    out_shape = jax.ShapeDtypeStruct((F, bs * N), out_dtype)

    if not rot_vel:
        out2d = pl.pallas_call(
            functools.partial(_pose_kernel, tb=tb, N=N),
            out_shape=out_shape,
            grid=grid,
            in_specs=[x_spec, resident, resident],
            out_specs=out_spec,
            compiler_params=compiler_params,
            cost_estimate=cost,
        )(xv, pose_w, pose_b2)
    else:
        vel_b2 = vel_b.reshape(1, N).astype(jnp.float32)
        out2d = pl.pallas_call(
            functools.partial(_rot_vel_kernel, tb=tb, N=N),
            out_shape=out_shape,
            grid=grid,
            in_specs=[x_spec, resident, resident, resident, resident],
            out_specs=out_spec,
            compiler_params=compiler_params,
            cost_estimate=cost,
        )(xv, pose_w, pose_b2, vel_w, vel_b2)

    # Free reshape (row-major contiguous): (F, bs*N) -> (F, bs, N).
    return out2d.reshape(F, bs, N)


def _reference(x, data_rep, pose_w, pose_b, vel_w=None, vel_b=None):
    bs, njoints, nfeats, nframes = x.shape
    xr = jnp.transpose(x, (3, 0, 1, 2)).reshape(nframes, bs, njoints * nfeats)
    if data_rep in ("rot6d", "xyz", "hml_vec"):
        return xr @ pose_w + pose_b
    elif data_rep == "rot_vel":
        first = xr[:1] @ pose_w + pose_b
        vel = xr[1:] @ vel_w + vel_b
        return jnp.concatenate([first, vel], axis=0)
    raise ValueError(data_rep)


if __name__ == "__main__":
    # Small shapes consistent with the module's forward.
    bs, njoints, nfeats, nframes = 2, 4, 4, 8
    input_feats = njoints * nfeats        # 16
    latent_dim = 32

    key = jax.random.PRNGKey(0)
    kx, kpw, kpb, kvw, kvb = jax.random.split(key, 5)

    x = jax.random.normal(kx, (bs, njoints, nfeats, nframes), dtype=jnp.float32)
    # Parameters stored as (in, out), i.e. torch Linear.weight^T.
    pose_w = jax.random.normal(kpw, (input_feats, latent_dim), jnp.float32) * 0.05
    pose_b = jax.random.normal(kpb, (latent_dim,), jnp.float32) * 0.05
    vel_w = jax.random.normal(kvw, (input_feats, latent_dim), jnp.float32) * 0.05
    vel_b = jax.random.normal(kvb, (latent_dim,), jnp.float32) * 0.05

    # Path 1: plain pose embedding ('hml_vec'/'rot6d'/'xyz'), f32.
    out1 = jax.block_until_ready(input_process(x, "hml_vec", pose_w, pose_b))
    ref1 = _reference(x, "hml_vec", pose_w, pose_b)
    np.testing.assert_allclose(np.asarray(out1), np.asarray(ref1),
                               rtol=1e-5, atol=1e-5)

    # Path 2: 'rot_vel' (frame 0 -> poseEmbedding, frames 1.. -> velEmbedding).
    out2 = jax.block_until_ready(
        input_process(x, "rot_vel", pose_w, pose_b, vel_w, vel_b))
    ref2 = _reference(x, "rot_vel", pose_w, pose_b, vel_w, vel_b)
    np.testing.assert_allclose(np.asarray(out2), np.asarray(ref2),
                               rtol=1e-5, atol=1e-5)

    # Path 3: bf16 compute (x / W), f32 accumulate + f32 output.
    out3 = jax.block_until_ready(
        input_process(x, "hml_vec", pose_w, pose_b, compute_dtype=jnp.bfloat16))
    np.testing.assert_allclose(np.asarray(out3), np.asarray(ref1),
                               rtol=2e-2, atol=1e-2)

    # Path 4: bf16 compute + bf16 output (memory-bound configs on v6e/v7x).
    out4 = jax.block_until_ready(
        input_process(x, "hml_vec", pose_w, pose_b,
                      compute_dtype=jnp.bfloat16, out_dtype=jnp.bfloat16))
    assert out4.dtype == jnp.bfloat16
    np.testing.assert_allclose(np.asarray(out4.astype(jnp.float32)),
                               np.asarray(ref1), rtol=3e-2, atol=3e-2)

    assert out1.shape == (nframes, bs, latent_dim)
    assert out2.shape == (nframes, bs, latent_dim)
    assert out3.shape == (nframes, bs, latent_dim)
    assert out4.shape == (nframes, bs, latent_dim)
    print("KERNEL_OK")
</pallas_src>

<mosaic_0001>
module attributes {stable_mosaic.version = 11 : i64} {
  func.func @_pose_kernel(%arg0: i32, %arg1: memref<2x16x8xf32, #tpu.memory_space<vmem>>, %arg2: memref<16x32xf32, #tpu.memory_space<vmem>>, %arg3: memref<1x32xf32, #tpu.memory_space<vmem>>, %arg4: memref<8x64xf32, #tpu.memory_space<vmem>>) attributes {dimension_semantics = [#tpu.dimension_semantics<parallel>], iteration_bounds = array<i64: 1>, scalar_prefetch = 0 : i64, scratch_operands = 0 : i64, tpu.core_type = #tpu.core_type<tc>, window_params = [{transform_indices = @transform_0, window_bounds = array<i64: 2, 16, 8>}, {pipeline_mode = #tpu.pipeline_mode<synchronous>, transform_indices = @transform_1, window_bounds = array<i64: 16, 32>}, {pipeline_mode = #tpu.pipeline_mode<synchronous>, transform_indices = @transform_2, window_bounds = array<i64: 1, 32>}, {transform_indices = @transform_3, window_bounds = array<i64: 8, 64>}]} {
    %c0 = arith.constant 0 : index
    %c0_0 = arith.constant 0 : index
    %0 = vector.load %arg2[%c0, %c0_0] : memref<16x32xf32, #tpu.memory_space<vmem>>, vector<16x32xf32>
    %c0_1 = arith.constant 0 : index
    %c0_2 = arith.constant 0 : index
    %1 = vector.load %arg3[%c0_1, %c0_2] : memref<1x32xf32, #tpu.memory_space<vmem>>, vector<1x32xf32>
    %c0_3 = arith.constant 0 : index
    %c0_4 = arith.constant 0 : index
    %c0_5 = arith.constant 0 : index
    %2 = vector.load %arg1[%c0_3, %c0_4, %c0_5] : memref<2x16x8xf32, #tpu.memory_space<vmem>>, vector<1x16x8xf32>
    %3 = vector.shape_cast %2 : vector<1x16x8xf32> to vector<16x8xf32>
    %4 = tpu.transpose %3, [1, 0] : vector<16x8xf32> -> vector<8x16xf32>
    %cst = arith.constant dense<0.000000e+00> : vector<8x32xf32>
    %5 = tpu.matmul %4, %0, %cst {dimension_numbers = #tpu.dot_dimension_numbers<[1], [0], [0], [1], [0, 0, 1, 1], [], []>} : vector<8x16xf32>, vector<16x32xf32>, vector<8x32xf32> -> vector<8x32xf32>
    %6 = vector.broadcast %1 : vector<1x32xf32> to vector<8x32xf32>
    %7 = arith.addf %5, %6 : vector<8x32xf32>
    %c0_6 = arith.constant 0 : index
    %c0_7 = arith.constant 0 : index
    %8 = vector.load %arg4[%c0_6, %c0_7] : memref<8x64xf32, #tpu.memory_space<vmem>>, vector<8x32xf32>
    tpu.vector_store %arg4[%c0_6, %c0_7], %7 {strides = array<i32>} : memref<8x64xf32, #tpu.memory_space<vmem>>, vector<8x32xf32>,
    %c1 = arith.constant 1 : index
    %c0_8 = arith.constant 0 : index
    %c0_9 = arith.constant 0 : index
    %9 = vector.load %arg1[%c1, %c0_8, %c0_9] : memref<2x16x8xf32, #tpu.memory_space<vmem>>, vector<1x16x8xf32>
    %10 = vector.shape_cast %9 : vector<1x16x8xf32> to vector<16x8xf32>
    %11 = tpu.transpose %10, [1, 0] : vector<16x8xf32> -> vector<8x16xf32>
    %cst_10 = arith.constant dense<0.000000e+00> : vector<8x32xf32>
    %12 = tpu.matmul %11, %0, %cst_10 {dimension_numbers = #tpu.dot_dimension_numbers<[1], [0], [0], [1], [0, 0, 1, 1], [], []>} : vector<8x16xf32>, vector<16x32xf32>, vector<8x32xf32> -> vector<8x32xf32>
    %13 = vector.broadcast %1 : vector<1x32xf32> to vector<8x32xf32>
    %14 = arith.addf %12, %13 : vector<8x32xf32>
    %c0_11 = arith.constant 0 : index
    %c32 = arith.constant 32 : index
    %15 = vector.load %arg4[%c0_11, %c32] : memref<8x64xf32, #tpu.memory_space<vmem>>, vector<8x32xf32>
    tpu.vector_store %arg4[%c0_11, %c32], %14 {strides = array<i32>} : memref<8x64xf32, #tpu.memory_space<vmem>>, vector<8x32xf32>,
    return
  }
  func.func @transform_0(%arg0: i32) -> (i32, i32, i32) {
    %c0_i32 = arith.constant 0 : i32
    %c0_i32_0 = arith.constant 0 : i32
    %c0_i32_1 = arith.constant 0 : i32
    return %arg0, %c0_i32, %c0_i32_0 : i32, i32, i32
  }
  func.func @transform_1(%arg0: i32) -> (i32, i32) {
    %c0_i32 = arith.constant 0 : i32
    %c0_i32_0 = arith.constant 0 : i32
    %c0_i32_1 = arith.constant 0 : i32
    return %c0_i32, %c0_i32_0 : i32, i32
  }
  func.func @transform_2(%arg0: i32) -> (i32, i32) {
    %c0_i32 = arith.constant 0 : i32
    %c0_i32_0 = arith.constant 0 : i32
    %c0_i32_1 = arith.constant 0 : i32
    return %c0_i32, %c0_i32_0 : i32, i32
  }
  func.func @transform_3(%arg0: i32) -> (i32, i32) {
    %c0_i32 = arith.constant 0 : i32
    %c0_i32_0 = arith.constant 0 : i32
    return %c0_i32, %arg0 : i32, i32
  }
}

</mosaic_0001>

<bundles_post_ra>
// kernel: tpu_custom_call.1
= control target key start
LH: loop header
LB: loop body
LE: loop exit
PB: predicated region body
PF: predicated region fallthrough
CT: control target
= control target key end

     0   :  { %v322_v6 = vmov 0.0|0.0   ;;  %vm323_vm0 = vmmov 0   ;;  %v324_v8 = vmov 0.0   ;;  %s380_s0 = inlined_call_operand.vmem [shape: f32[2,16,8], index: 0, kind: input, shape index: {}]   ;;  %s381_s1 = inlined_call_operand.vmem [shape: f32[16,32], index: 1, kind: input, shape index: {}]   ;;  %s382_s2 = inlined_call_operand.vmem [shape: f32[1,32], index: 2, kind: input, shape index: {}]   ;;  %s383_s3 = inlined_call_operand.hbm [shape: f32[8,64], index: 3, kind: output, shape index: {}]  }
   0x1   :  { %v264_v0 = vld [vmem:[%s380_s0 + $0x10] sm:$0xff]  ;;  %v18_v1 = vld [vmem:[%s380_s0] sm:$0xff]  ;;  %v16_v3 = vld [vmem:[%s381_s1 + $0x8] sm:$0xff]  ;;  %290 = vmatprep.subr.bf16.mxu1 %v322_v6  ;;  %284 = vmatprep.mubr.msk.f32.mxu1 %vm323_vm0, %v324_v8 }
   0x2   :  { %137 = vxpose.xlu0.b32.start [1/2] (short) (narrow) %v264_v0, 8  ;;  %20 = vxpose.xlu1.b32.start [1/2] (short) (narrow) %v18_v1, 8  ;;  %v15_v2 = vld [vmem:[%s381_s1] sm:$0xff]  ;;  %v265_v4 = vld [vmem:[%s380_s0 + $0x18] sm:$0xff]  ;;  %v19_v5 = vld [vmem:[%s380_s0 + $0x8] sm:$0xff] }
   0x3   :  { %v288_v7 = vpack.c.bf16 %v16_v3, %v15_v2 }
   0x4   :  { %8 = vsyncpa [#allocation3], 0  ;;  %287 = vmatprep.subr.bf16.mxu0 %v322_v6  ;;  %277 = vmatprep.mubr.msk.f32.mxu0 %vm323_vm0, %v324_v8  ;;  %vm58_vm1 = vcmask 130048   ;;  %v262_v11 = vld [vmem:[%s382_s2] ss:$0 sm:$0xff]  ;;  %vm132_vm2 = vcmask 261120  }
   0x5   :  { %292 = vmatpush3.bf16.msra.mxu1 %v288_v7  ;;  %289 = vmatpush3.bf16.msra.mxu0 %v288_v7  ;;  %s325_s24 = smov 32   ;;  %s326_s25 = smov [#allocation2]   ;;  %vm246_vm3 = vcmask 523520  }
   0x6   :  { %138 = vxpose.xlu0.b32.end [2/2] (short) (narrow) %v265_v4, 8  ;;  %21 = vxpose.xlu1.b32.end [2/2] (short) (narrow) %v19_v5, 8  ;;  %s254_s26 = sshll.u32 %s326_s25, 4  ;;  %s255_s26 = int_to_ptr.vmem [resolvable:$true] %s254_s26 }
   0x7   :  { %s298_s27 = scalar_lea.vmem %s255_s26, 128  ;;  %p303_p1 = scmp.lt.s32.totalorder %s255_s26, %s255_s26 }
   0x8   :  { %p299_p0 = scmp.ne.s32.totalorder %s255_s26, %s298_s27  ;;  %p304_p2 = scmp.lt.s32.totalorder %s298_s27, %s298_s27 }
   0xa   :  { %p305_p3 = por %p304_p2, %p303_p1 }
   0xc   :  { %p306_p4 = pnand %p305_p3, %p299_p0 }
  0x82   :  { %v153_v9 = vpop.trf.xlu0  ;;  %v36_v10 = vpop.trf.xlu1 }
  0x83   :  { %285 = vmatmul.mubr.msk.f32.vlgmr.msra.gmra.mrb[0].mxu1 %vm58_vm1, %v153_v9  ;;  %278 = vmatmul.mubr.msk.f32.vlgmr.msra.gmra.mrb[0].mxu0 %vm58_vm1, %v36_v10 }
 0x156   :  { %v238_v12 = vpop.f32.mrb[0].mxu1  ;;  %v128_v13 = vpop.f32.mrb[0].mxu0 }
 0x157   :  { %v239_v14 = vadd.f32 %v262_v11, %v238_v12  ;;  %v286_v15 = vpop.f32.mrb[1].mxu1  ;;  %v129_v16 = vadd.f32 %v262_v11, %v128_v13  ;;  %v279_v17 = vpop.f32.mrb[1].mxu0 }
 0x159   :  { %243 = vrot.lane.b32.xlu0 %v239_v14, %s325_s24  ;;  %133 = vst.msk [vmem:[#allocation2] sm:$0xff] %vm132_vm2, %v129_v16 }
 0x1cb   :  { %v244_v18 = vpop.permute.xlu0 %243 }
 0x1cc   :  { %247 = vst.msk [vmem:[#allocation2] sm:$0xff] %vm246_vm3, %v244_v18 }
 0x1cd   :  { %309 = shalt.err (!%p306_p4)
}
 0x1ce   :  { %s310_s29 = scalar_lea.hbm %s383_s3, 128 }
 0x1cf   :  { %p311_p5 = scmp.ne.s32.totalorder %s383_s3, %s310_s29  ;;  %p314_p6 = scmp.lt.u32.totalorder %s310_s29, %s383_s3 }
 0x1d1   :  { %p316_p7 = pnand %p314_p6, %p311_p5 }
 0x1d3   :  { %319 = shalt.err (!%p316_p7)
}
 0x1d4   :  { %257 = dma.vmem_to_hbm [thread:$0]  %s255_s26, 128, %s383_s3, [#allocation3]  }
 0x1d5   :  { %320 = dma.done.wait [#allocation3], 128  }
 0x1d6   :  { %321 = vsyncadd [#allocation3], 4294967168 }
 0x1d7   :  { %261 = vsyncpa [#allocation3], 1 }

</bundles_post_ra>
